<compile_context>
chip_gen: v7x
topology: tpu7x:2x2x1
jax: 0.10.0
libtpu: 0.0.40
codegen_flags: <defaults>
</compile_context>

<pallas_src>
import jax
import jax.numpy as jnp
from jax.experimental import pallas as pl
from jax.experimental.pallas import tpu as pltpu


def _up_deconv_kernel(x_ref, w_ref, b_ref, o_ref):
    """One (batch image, row-block) grid step.

    x_ref: [1, C, th*W]        NCHW slab, spatial dims pre-flattened (free view)
    w_ref: [C, 4*C]            columns ordered (di, dj, c_out)
    b_ref: [1, 4*C]            bias tiled to match that column order
    o_ref: [1, th, 2, W, 2*C]  NHWC-interleaved output slab
    """
    th = o_ref.shape[1]
    w_sp = o_ref.shape[3]
    two_c = o_ref.shape[4]

    x = x_ref[0]                          # [C, th*W]  channels on sublanes
    xt = x.T                              # [th*W, C]  spatial rows, channel lanes (XLU)
    acc = jnp.dot(xt, w_ref[...], preferred_element_type=jnp.float32)
    acc = (acc + b_ref[...]).astype(o_ref.dtype)          # [th*W, 4C]

    # Columns [di*2C:(di+1)*2C] hold the (dj, c_out) values of output row 2h+di.
    # Splitting the row dim th*W -> (th, W) is a pure sublane re-tiling (no lane
    # movement); the store target absorbs the rest of the interleave.
    o_ref[0, :, 0, :, :] = acc[:, :two_c].reshape(th, w_sp, two_c)
    o_ref[0, :, 1, :, :] = acc[:, two_c:].reshape(th, w_sp, two_c)


def _pick_row_tile(n, c, h, w, itemsize, vmem_budget_bytes):
    """Largest th dividing h with a legal BlockSpec ((th*w) % 128 == 0 or th == h)
    whose (double-buffered) blocks fit the VMEM budget."""
    legal = [th for th in range(h, 0, -1)
             if h % th == 0 and ((th * w) % 128 == 0 or th == h)]

    def vmem_need(th):
        in_blk = c * th * w                 # input slab
        out_blk = th * 2 * w * 2 * c        # output slab
        wgt = c * 4 * c + 4 * c             # weight + bias (constant index map)
        return (2 * (in_blk + out_blk) + 2 * wgt) * itemsize  # 2x = double-buffering

    fitting = [th for th in legal if vmem_need(th) <= vmem_budget_bytes]
    if not fitting:
        fitting = [legal[-1]]               # smallest legal tile as a fallback
    th = fitting[0]                         # largest fitting tile
    if n == 1:                              # keep >= 2 grid steps for v7x's 2 TCs
        for cand in fitting:
            if h // cand >= 2:
                th = cand
                break
    return th, vmem_need(th)


def up_forward(x1, x, weight, bias, *, vmem_budget_bytes=24 * 1024 * 1024):
    """Pallas implementation of Up.forward(x1, x).

    x1:     [N, C, H, W]      (NCHW, like PyTorch)
    x:      [N, C, H2, W2]    (only its spatial size is used, as in PyTorch)
    weight: [C, C, 2, 2]      (ConvTranspose2d weight: [in, out, kH, kW])
    bias:   [C]
    returns [N, C, H2, W2]    (NCHW)
    """
    n, c, h, w = x1.shape
    itemsize = jnp.dtype(x1.dtype).itemsize
    th, blk_bytes = _pick_row_tile(n, c, h, w, itemsize, vmem_budget_bytes)

    # Free views / tiny reshapes only (no extra HBM pass over x1).
    x_flat = x1.reshape(n, c, h * w)                                  # NCHW view
    w_mat = jnp.transpose(weight, (0, 2, 3, 1)).reshape(c, 4 * c)     # cols (di,dj,co)
    b_mat = jnp.tile(bias, 4).reshape(1, 4 * c)

    # Budget keeps this at 32 MiB for sane shapes -> safe on v5e/v6e/v7x.
    vmem_limit = int(max(32 * 1024 * 1024, blk_bytes + 8 * 1024 * 1024))

    out5 = pl.pallas_call(
        _up_deconv_kernel,
        out_shape=jax.ShapeDtypeStruct((n, h, 2, w, 2 * c), x1.dtype),
        grid_spec=pltpu.PrefetchScalarGridSpec(
            num_scalar_prefetch=0,
            grid=(n, h // th),
            in_specs=[
                pl.BlockSpec((1, c, th * w), lambda ni, hb: (ni, 0, hb)),
                pl.BlockSpec((c, 4 * c), lambda ni, hb: (0, 0)),
                pl.BlockSpec((1, 4 * c), lambda ni, hb: (0, 0)),
            ],
            out_specs=pl.BlockSpec((1, th, 2, w, 2 * c),
                                   lambda ni, hb: (ni, hb, 0, 0, 0)),
        ),
        compiler_params=pltpu.CompilerParams(
            dimension_semantics=("parallel", "parallel"),
            vmem_limit_bytes=vmem_limit),
    )(x_flat, w_mat, b_mat)

    # [N, H, 2, W, 2C] is exactly NHWC [N, 2H, 2W, C] in row-major order.
    x2 = out5.reshape(n, 2 * h, 2 * w, c)          # free (contiguous) reshape
    x2 = jnp.transpose(x2, (0, 3, 1, 2))           # single NHWC -> NCHW pass

    diff_y = x.shape[2] - x2.shape[2]
    diff_x = x.shape[3] - x2.shape[3]
    # TODO(synk): negative diffs (cropping) unhandled; DRANet usage keeps x >= x2.
    # TODO(synk): the pad (and NHWC->NCHW conversion) stay in XLA; the NCHW
    # dj-interleave cannot be expressed as a rectangular BlockSpec write.
    return jnp.pad(
        x2,
        ((0, 0), (0, 0),
         (diff_y // 2, diff_y - diff_y // 2),
         (diff_x // 2, diff_x - diff_x // 2)))


def up_forward_reference(x1, x, weight, bias):
    """Pure-JAX reference (no overlap, stride==kernel==2)."""
    n, c, h, w = x1.shape
    y = jnp.einsum('ncij,cokl->noikjl', x1, weight).reshape(n, c, 2 * h, 2 * w)
    y = y + bias[None, :, None, None]
    diff_y = x.shape[2] - y.shape[2]
    diff_x = x.shape[3] - y.shape[3]
    return jnp.pad(
        y,
        ((0, 0), (0, 0),
         (diff_y // 2, diff_y - diff_y // 2),
         (diff_x // 2, diff_x - diff_x // 2)))


if __name__ == "__main__":
    key = jax.random.PRNGKey(0)
    k1, k2, k3, k4 = jax.random.split(key, 4)

    N, C, H, W = 2, 4, 8, 8          # x1: [2, 4, 8, 8] -> x2: [2, 4, 16, 16]
    H2, W2 = 18, 17                  # x:  [2, 4, 18, 17] -> exercises F.pad

    x1 = jax.random.normal(k1, (N, C, H, W), dtype=jnp.float32)
    x = jax.random.normal(k2, (N, C, H2, W2), dtype=jnp.float32)

    # Deterministic ConvTranspose2d parameters: weight [in=C, out=C, 2, 2], bias [C].
    fan = C * 2 * 2
    bound = 1.0 / jnp.sqrt(fan)
    weight = jax.random.uniform(k3, (C, C, 2, 2), dtype=jnp.float32,
                                minval=-bound, maxval=bound)
    bias = jax.random.uniform(k4, (C,), dtype=jnp.float32,
                              minval=-bound, maxval=bound)

    out = up_forward(x1, x, weight, bias)
    out = jax.block_until_ready(out)

    ref = up_forward_reference(x1, x, weight, bias)
    assert out.shape == (N, C, H2, W2), out.shape
    assert jnp.allclose(out, ref, atol=1e-5, rtol=1e-5), "mismatch vs reference"

    print("KERNEL_OK")
</pallas_src>

<mosaic_0001>
module attributes {stable_mosaic.version = 11 : i64} {
  func.func @_up_deconv_kernel(%arg0: i32, %arg1: i32, %arg2: memref<1x4x64xf32, #tpu.memory_space<vmem>>, %arg3: memref<4x16xf32, #tpu.memory_space<vmem>>, %arg4: memref<1x16xf32, #tpu.memory_space<vmem>>, %arg5: memref<1x8x2x8x8xf32, #tpu.memory_space<vmem>>) attributes {dimension_semantics = [#tpu.dimension_semantics<parallel>, #tpu.dimension_semantics<parallel>], iteration_bounds = array<i64: 2, 1>, scalar_prefetch = 0 : i64, scratch_operands = 0 : i64, tpu.core_type = #tpu.core_type<tc>, window_params = [{transform_indices = @transform_0, window_bounds = array<i64: 1, 4, 64>}, {pipeline_mode = #tpu.pipeline_mode<synchronous>, transform_indices = @transform_1, window_bounds = array<i64: 4, 16>}, {pipeline_mode = #tpu.pipeline_mode<synchronous>, transform_indices = @transform_2, window_bounds = array<i64: 1, 16>}, {transform_indices = @transform_3, window_bounds = array<i64: 1, 8, 2, 8, 8>}]} {
    %c0 = arith.constant 0 : index
    %c0_0 = arith.constant 0 : index
    %c0_1 = arith.constant 0 : index
    %0 = vector.load %arg2[%c0, %c0_0, %c0_1] : memref<1x4x64xf32, #tpu.memory_space<vmem>>, vector<1x4x64xf32>
    %1 = vector.shape_cast %0 : vector<1x4x64xf32> to vector<4x64xf32>
    %2 = tpu.transpose %1, [1, 0] : vector<4x64xf32> -> vector<64x4xf32>
    %c0_2 = arith.constant 0 : index
    %c0_3 = arith.constant 0 : index
    %3 = vector.load %arg3[%c0_2, %c0_3] : memref<4x16xf32, #tpu.memory_space<vmem>>, vector<4x16xf32>
    %cst = arith.constant dense<0.000000e+00> : vector<64x16xf32>
    %4 = tpu.matmul %2, %3, %cst {dimension_numbers = #tpu.dot_dimension_numbers<[1], [0], [0], [1], [0, 0, 1, 1], [], []>} : vector<64x4xf32>, vector<4x16xf32>, vector<64x16xf32> -> vector<64x16xf32>
    %c0_4 = arith.constant 0 : index
    %c0_5 = arith.constant 0 : index
    %5 = vector.load %arg4[%c0_4, %c0_5] : memref<1x16xf32, #tpu.memory_space<vmem>>, vector<1x16xf32>
    %6 = vector.broadcast %5 : vector<1x16xf32> to vector<64x16xf32>
    %7 = arith.addf %4, %6 : vector<64x16xf32>
    %8 = vector.extract_strided_slice %7 {offsets = [0, 0], sizes = [64, 8], strides = [1, 1]} : vector<64x16xf32> to vector<64x8xf32>
    %9 = vector.shape_cast %8 : vector<64x8xf32> to vector<8x8x8xf32>
    %c0_6 = arith.constant 0 : index
    %c0_7 = arith.constant 0 : index
    %c0_8 = arith.constant 0 : index
    %c0_9 = arith.constant 0 : index
    %c0_10 = arith.constant 0 : index
    %10 = vector.load %arg5[%c0_6, %c0_7, %c0_8, %c0_9, %c0_10] : memref<1x8x2x8x8xf32, #tpu.memory_space<vmem>>, vector<1x8x1x8x8xf32>
    %11 = vector.shape_cast %10 : vector<1x8x1x8x8xf32> to vector<8x8x8xf32>
    %12 = vector.shape_cast %9 : vector<8x8x8xf32> to vector<1x8x1x8x8xf32>
    tpu.vector_store %arg5[%c0_6, %c0_7, %c0_8, %c0_9, %c0_10], %12 {strides = array<i32>} : memref<1x8x2x8x8xf32, #tpu.memory_space<vmem>>, vector<1x8x1x8x8xf32>,
    %13 = vector.extract_strided_slice %7 {offsets = [0, 8], sizes = [64, 8], strides = [1, 1]} : vector<64x16xf32> to vector<64x8xf32>
    %14 = vector.shape_cast %13 : vector<64x8xf32> to vector<8x8x8xf32>
    %c0_11 = arith.constant 0 : index
    %c0_12 = arith.constant 0 : index
    %c1 = arith.constant 1 : index
    %c0_13 = arith.constant 0 : index
    %c0_14 = arith.constant 0 : index
    %15 = vector.load %arg5[%c0_11, %c0_12, %c1, %c0_13, %c0_14] : memref<1x8x2x8x8xf32, #tpu.memory_space<vmem>>, vector<1x8x1x8x8xf32>
    %16 = vector.shape_cast %15 : vector<1x8x1x8x8xf32> to vector<8x8x8xf32>
    %17 = vector.shape_cast %14 : vector<8x8x8xf32> to vector<1x8x1x8x8xf32>
    tpu.vector_store %arg5[%c0_11, %c0_12, %c1, %c0_13, %c0_14], %17 {strides = array<i32>} : memref<1x8x2x8x8xf32, #tpu.memory_space<vmem>>, vector<1x8x1x8x8xf32>,
    return
  }
  func.func @transform_0(%arg0: i32, %arg1: i32) -> (i32, i32, i32) {
    %c0_i32 = arith.constant 0 : i32
    %c0_i32_0 = arith.constant 0 : i32
    return %arg0, %c0_i32, %arg1 : i32, i32, i32
  }
  func.func @transform_1(%arg0: i32, %arg1: i32) -> (i32, i32) {
    %c0_i32 = arith.constant 0 : i32
    %c0_i32_0 = arith.constant 0 : i32
    %c0_i32_1 = arith.constant 0 : i32
    return %c0_i32, %c0_i32_0 : i32, i32
  }
  func.func @transform_2(%arg0: i32, %arg1: i32) -> (i32, i32) {
    %c0_i32 = arith.constant 0 : i32
    %c0_i32_0 = arith.constant 0 : i32
    %c0_i32_1 = arith.constant 0 : i32
    return %c0_i32, %c0_i32_0 : i32, i32
  }
  func.func @transform_3(%arg0: i32, %arg1: i32) -> (i32, i32, i32, i32, i32) {
    %c0_i32 = arith.constant 0 : i32
    %c0_i32_0 = arith.constant 0 : i32
    %c0_i32_1 = arith.constant 0 : i32
    %c0_i32_2 = arith.constant 0 : i32
    return %arg0, %arg1, %c0_i32, %c0_i32_0, %c0_i32_1 : i32, i32, i32, i32, i32
  }
}

</mosaic_0001>

<bundles_post_ra>
// kernel: tpu_custom_call.1
= control target key start
LH: loop header
LB: loop body
LE: loop exit
PB: predicated region body
PF: predicated region fallthrough
CT: control target
= control target key end

     0   :  { %8 = vsyncpa [#allocation3], 0  ;;  %s1128_s0 = inlined_call_operand.hbm [shape: f32[2,4,64], index: 0, kind: input, shape index: {}]   ;;  %s1129_s1 = inlined_call_operand.hbm [shape: f32[4,16], index: 1, kind: input, shape index: {}]   ;;  %s1130_s2 = inlined_call_operand.vmem [shape: f32[1,16], index: 2, kind: input, shape index: {}]   ;;  %s1131_s3 = inlined_call_operand.hbm [shape: f32[2,8,2,8,8], index: 3, kind: output, shape index: {}]  }
   0x1   :  { %10 = vsyncpa [#allocation3 + $0x1], 0 }
   0x2   :  { %11 = vsyncpa [#allocation6], 0 }
   0x3   :  { %12 = vsyncpa [#allocation4], 0 }
   0x4   :  { %14 = vsyncpa [#allocation4 + $0x1], 0  ;;  %s863_s12 = smov 0   ;;  %s865_s13 = smov 0  }
   0x5   :  { %s867_s14 = smov 0   ;;  %s869_s15 = smov 0  }
   0x6   :  { %s871_s16 = smov 0   ;;  %s873_s17 = smov 0  }
   0x7 LB: > { %s554_s18 = sadd.s32 4294967295, %s835_s17   ;;  %s555_s19 = sadd.s32 4294967294, %s835_s17   ;;  %s835_s17 = sphi %s873_s17, %s20_s17   ;;  %s831_s16 = sphi %s871_s16, %s1156_s16   ;;  %s827_s15 = sphi %s869_s15, %s1155_s15   ;;  %s823_s14 = sphi %s867_s14, %s1154_s14   ;;  %s819_s13 = sphi %s865_s13, %s1153_s13   ;;  %s815_s12 = sphi %s863_s12, %s1152_s12  }
   0x8   : > { %p54_p0 = scmp.ne.s32.totalorder %s819_s13, %s815_s12  ;;  %p897_p1 = scmp.eq.s32.totalorder %s554_s18, 0 }
   0x9   : > { %p901_p2 = scmp.eq.s32.totalorder %s554_s18, 1  ;;  %p128_p3 = scmp.eq.s32.totalorder %s555_s19, 1 }
   0xa   : > { %s1136_s20 = scalar_select %p897_p1, 1, 0 }
   0xb   : > { %s1137_s21 = scalar_select %p901_p2, 1, 0 }
   0xc   : > { %p907_p4 = por %p897_p1, %p54_p0  ;;  %p556_p5 = scmp.ge.s32.totalorder %s835_s17, 1 }
   0xd   : > { %p912_p6 = por %p128_p3, %p54_p0  ;;  %p135_p7 = scmp.lt.s32.totalorder %s835_s17, 3 }
   0xe   : > { %s1138_s22 = scalar_select %p907_p4, 1, 0 }
   0xf   : > { %s1139_s23 = scalar_select %p912_p6, 1, 0 }
  0x10   : > { %p917_p8 = pnand %p556_p5, %p135_p7  ;;  %s837_s25 = smov [#allocation5]  }
  0x11   : > { %s148_s26 = sshll.u32 %s837_s25, 4  ;;  %s32_s28 = sadd.s32 1, %s831_s16  ;;  %s149_s26 = int_to_ptr.vmem [resolvable:$true] %s148_s26 }
  0x12   : > { %s1140_s24 = scalar_select %p917_p8, 1, 0 }
  0x13   : > { %p622_p10 = pneg %p917_p8  ;;  %s41_s29 = sadd.s32 1, %s823_s14 }
  0x14   : > { %p932_p12 = scmp.ge.s32.totalorder %s32_s28, 2  ;;  %s691_s6 = scalar_lea.hbm %s1129_s1, 64 }
  0x15   : > { %p926_p11 = pnand %p622_p10, %p897_p1  ;;  %p692_p13 = scmp.ne.s32.totalorder %s1129_s1, %s691_s6 }
  0x16   : > { %s1142_s30 = scalar_select %p932_p12, 1, 0 }
  0x17   : > { %p693_p0 = pneg %p926_p11  ;;  %p698_p7 = scmp.lt.u32.totalorder %s691_s6, %s1129_s1 }
  0x19   : > { %p694_p3 = pnand %p693_p0, %p692_p13 }
  0x1b   : > { %p695_p5 = pneg %p694_p3 }
  0x1d   : > { %p700_p10 = pnand %p698_p7, %p695_p5 }
  0x1f   : > { %703 = shalt.err (!%p700_p10)
}
  0x20   : > { %s704_s11 = scalar_lea.vmem %s149_s26, 64  ;;  %p712_p4 = scmp.lt.s32.totalorder %s149_s26, %s149_s26 }
  0x21   : > { %p705_p9 = scmp.ne.s32.totalorder %s149_s26, %s704_s11  ;;  %p713_p8 = scmp.lt.s32.totalorder %s704_s11, %s704_s11 }
  0x23   : > { %p707_p6 = pnand %p705_p9, %p693_p0  ;;  %p714_p2 = por %p713_p8, %p712_p4 }
  0x25   : > { %p708_p1 = pneg %p707_p6 }
  0x27   : > { %p715_p12 = pnand %p714_p2, %p708_p1 }
  0x29   : > { %718 = shalt.err (!%p715_p12)
}
  0x2a   : > { %625 = dma.hbm_to_vmem [thread:$0]  (!%p926_p11), %s1129_s1, 64, %s149_s26, [#allocation6]  }
  0x2b   : > { %p1143_p4 = scmp.ne.s32.totalorder %s1142_s30, 0  ;;  %p48_p1 = scmp.ne.s32.totalorder %s823_s14, %s819_s13 }
  0x2c   : > { %p49_p2 = scmp.eq.s32.totalorder %s835_s17, 0  ;;  %p635_p6 = scmp.lt.s32.totalorder %s835_s17, 2 }
  0x2d   : > { %s1158_s28 = smov (%p1143_p4, %s32_s28), 0  ;;  %p1144_p12 = scmp.ne.s32.totalorder %s1137_s21, 0 }
  0x2e   : > { %s36_s25 = ssub.s32 %s831_s16, %s1158_s28  ;;  %p50_p9 = por %p49_p2, %p48_p1 }
  0x2f   : > { %p39_p8 = scmp.eq.s32.totalorder %s36_s25, 0  ;;  %p964_p13 = por %p1144_p12, %p48_p1 }
  0x30   : > { %s162_s4 = sand.u32 1, %s823_s14   ;;  %s560_s30 = sshll.u32 %s831_s16, 6 }
  0x31   : > { %s972_s5 = scalar_select %p39_p8, %s823_s14, %s41_s29  }
  0x32   : > { %s559_s26 = sshll.u32 %s162_s4, 2  ;;  %s978_s8 = scalar_lea.hbm %s1128_s0, %s560_s30 }
  0x33   : > { %s166_s21 = scalar_lea.vmem [#allocation2], %s559_s26  ;;  %p982_p11 = pnand %p635_p6, %p50_p9 }
  0x34   : > { %s174_s9 = sshll.u32 %s166_s21, 4  ;;  %s163_s29 = scalar_lea.sflag [#allocation3], %s162_s4  ;;  %s980_s9 = int_to_ptr.vmem [resolvable:$true] %s174_s9 }
  0x35   : > { %s719_s11 = scalar_lea.hbm %s978_s8, 64  ;;  %p721_p3 = pneg %p982_p11 }
  0x36   : > { %p720_p0 = scmp.ne.s32.totalorder %s978_s8, %s719_s11  ;;  %s724_s25 = scalar_lea.hbm %s1128_s0, 128 }
  0x37   : > { %p725_p10 = scmp.lt.u32.totalorder %s978_s8, %s1128_s0  ;;  %p726_p4 = scmp.lt.u32.totalorder %s724_s25, %s719_s11 }
  0x38   : > { %p722_p5 = pnand %p721_p3, %p720_p0  ;;  %p728_p2 = scmp.lt.u32.totalorder %s719_s11, %s978_s8 }
  0x39   : > { %p727_p1 = por %p726_p4, %p725_p10 }
  0x3a   : > { %p723_p7 = pneg %p722_p5 }
  0x3b   : > { %p729_p6 = por %p728_p2, %p727_p1 }
  0x3d   : > { %p730_p8 = pnand %p729_p6, %p723_p7 }
  0x3f   : > { %733 = shalt.err (!%p730_p8)
}
  0x40   : > { %s734_s4 = scalar_lea.vmem %s980_s9, 64  ;;  %s838_s6 = smov [#allocation2]  }
  0x41   : > { %p735_p9 = scmp.ne.s32.totalorder %s980_s9, %s734_s4  ;;  %s739_s7 = sshll.u32 %s838_s6, 4  ;;  %s740_s7 = int_to_ptr.vmem [resolvable:$false] %s739_s7 }
  0x42   : > { %s741_s21 = scalar_lea.vmem %s740_s7, 128  ;;  %p742_p5 = scmp.lt.s32.totalorder %s980_s9, %s740_s7 }
  0x43   : > { %p737_p12 = pnand %p735_p9, %p721_p3  ;;  %p743_p10 = scmp.lt.s32.totalorder %s741_s21, %s734_s4 }
  0x45   : > { %p738_p0 = pneg %p737_p12  ;;  %p744_p4 = por %p743_p10, %p742_p5 }
  0x47   : > { %p745_p1 = pnand %p744_p4, %p738_p0 }
  0x49   : > { %748 = shalt.err (!%p745_p1)
}
  0x4a   : > { %629 = dma.hbm_to_vmem [thread:$0]  (!%p982_p11), %s978_s8, 64, %s980_s9, %s163_s29  }
  0x4b   : > { %p1147_p7 = scmp.ne.s32.totalorder %s1140_s24, 0 }
  0x4c   : > { %s1014_s11 = sand.u32 (!%p1147_p7), 1, %s819_s13   ;;  %p1148_p3 = scmp.ne.s32.totalorder (!%p1147_p7), %s1138_s22, 0 }
  0x4d   : > { %183 = sbr.rel (%p1147_p7) target bundleno = 595 (0x253), region = 32  ;;  %s562_s18 = sshll.u32 (!%p1147_p7), %s1014_s11, 2 }
  0x4e   : > { %s186_s19 = scalar_lea.sflag (!%p1147_p7), [#allocation3], %s1014_s11  ;;  %s189_s25 = scalar_lea.vmem (!%p1147_p7), [#allocation2], %s562_s18 }
  0x54   : > { %802 = dma.done.wait (%p1148_p3), %s186_s19, 64  }
  0x55   : > { %804 = vsyncadd (%p1148_p3), %s186_s19, 4294967232  ;;  %p1149_p2 = scmp.ne.s32.totalorder %s1136_s20, 0 }
  0x57   : > { %806 = dma.done.wait (%p1149_p2), [#allocation6], 64  }
  0x58   : > { %808 = vsyncadd (%p1149_p2), [#allocation6], 4294967232  ;;  %v217_v0 = vld [vmem:[%s189_s25] sm:$0xf]  ;;  %v250_v1 = vld [vmem:[#allocation5] sm:$0xf] }
  0x59   : > { %218 = vxpose.xlu0.b32.start.end [1/1] (short) (narrow) %v217_v0, 64  ;;  %vm283_vm0 = vcmask 1043456   ;;  %vm258_vm1 = vcmask 31744   ;;  %s564_s20 = sshll.u32 %s1014_s11, 7  ;;  %v565_v10 = vld [vmem:[%s1130_s2] ss:$0 sm:$0xff] }
  0x5a   : > { %598 = vmatprep.subr.msk.mxu0 %vm283_vm0, %v250_v1  ;;  %612 = vmatprep.subr.msk.mxu1 %vm283_vm0, %v250_v1  ;;  %vm392_vm2 = vcmask 64512   ;;  %s1038_s8 = scalar_lea.vmem [#allocation7], %s564_s20  ;;  %s839_s9 = smov 120  }
  0x5b   : > { %599 = vmatpush3.msk.msra.mxu0 %vm283_vm0, %v250_v1  ;;  %613 = vmatpush3.msk.msra.mxu1 %vm283_vm0, %v250_v1  ;;  %s588_s10 = sshll.u32 %s827_s15, 11  ;;  %s459_s29 = sshll.u32 %s1038_s8, 4  ;;  %s1077_s29 = int_to_ptr.vmem [resolvable:$true] %s459_s29 }
  0x5c   : > { %s1075_s4 = scalar_lea.hbm %s1131_s3, %s588_s10  ;;  %s443_s6 = scalar_lea.sflag [#allocation4], %s1014_s11 }
  0x5d   : > { %s749_s7 = scalar_lea.vmem %s1077_s29, 2048  ;;  %s840_s15 = smov [#allocation7]  }
  0x5e   : > { %p750_p11 = scmp.ne.s32.totalorder %s1077_s29, %s749_s7  ;;  %s753_s21 = sshll.u32 %s840_s15, 4  ;;  %s754_s21 = int_to_ptr.vmem [resolvable:$false] %s753_s21 }
  0x5f   : > { %s755_s18 = scalar_lea.vmem %s754_s21, 4096  ;;  %p756_p9 = scmp.lt.s32.totalorder %s1077_s29, %s754_s21 }
  0x60   : > { %p751_p6 = pnand %p750_p11, %p964_p13  ;;  %p757_p12 = scmp.lt.s32.totalorder %s755_s18, %s749_s7 }
  0x62   : > { %p752_p8 = pneg %p751_p6  ;;  %p758_p0 = por %p757_p12, %p756_p9 }
  0x64   : > { %p759_p5 = pnand %p758_p0, %p752_p8 }
  0xd9   : > { %v234_v2 = vpop.trf.xlu0 }
  0xda   : > { %600 = vmatprep.mubr.msk.f32.mxu0 %vm258_vm1, %v234_v2 }
  0xdd   : > { %v235_v3 = vpop.trf.xlu0 }
  0xde   : > { %601 = vmatmul.mubr.msk.f32.vlgmr.msra.gmra.mrb[0].mxu0 %vm258_vm1, %v235_v3 }
  0xe1   : > { %v236_v4 = vpop.trf.xlu0 }
  0xe2   : > { %603 = vmatprep.mubr.msk.f32.mxu0 %vm258_vm1, %v236_v4 }
  0xe5   : > { %v237_v5 = vpop.trf.xlu0 }
  0xe6   : > { %604 = vmatmul.mubr.msk.f32.gmra.mrb[2].mxu0 %vm258_vm1, %v237_v5 }
  0xe9   : > { %v238_v6 = vpop.trf.xlu0 }
  0xea   : > { %606 = vmatprep.mubr.msk.f32.mxu1 %vm258_vm1, %v238_v6 }
  0xed   : > { %v239_v7 = vpop.trf.xlu0 }
  0xee   : > { %607 = vmatmul.mubr.msk.f32.vlgmr.msra.gmra.mrb[0].mxu1 %vm258_vm1, %v239_v7 }
  0xf1   : > { %v240_v8 = vpop.trf.xlu0 }
  0xf2   : > { %609 = vmatprep.mubr.msk.f32.mxu1 %vm258_vm1, %v240_v8 }
  0xf5   : > { %v241_v9 = vpop.trf.xlu0 }
  0xf6   : > { %610 = vmatmul.mubr.msk.f32.gmra.mrb[2].mxu1 %vm258_vm1, %v241_v9 }
 0x1b1   : > { %v602_v11 = vpop.f32.mrb[0].mxu0 }
 0x1b2   : > { %v359_v12 = vadd.f32 %v602_v11, %v565_v10  ;;  %v353_v13 = vpop.f32.mrb[1].mxu0 }
 0x1b3   : > { %v354_v14 = vadd.f32 %v565_v10, %v353_v13 }
 0x1b4   : > { %394 = vst.msk [vmem:[%s1038_s8 + $0x10] sm:$0xff] %vm392_vm2, %v359_v12  ;;  %411 = vrot.lane.b32.xlu1 %v359_v12, %s839_s9 }
 0x1b5   : > { %393 = vst.msk [vmem:[%s1038_s8] sm:$0xff] %vm392_vm2, %v354_v14  ;;  %409 = vrot.lane.b32.xlu0 %v354_v14, %s839_s9 }
 0x1b9   : > { %v605_v15 = vpop.f32.mrb[2].mxu0 }
 0x1ba   : > { %v369_v16 = vadd.f32 %v605_v15, %v565_v10  ;;  %v363_v17 = vpop.f32.mrb[3].mxu0 }
 0x1bb   : > { %v364_v18 = vadd.f32 %v565_v10, %v363_v17 }
 0x1bc   : > { %396 = vst.msk [vmem:[%s1038_s8 + $0x30] sm:$0xff] %vm392_vm2, %v369_v16  ;;  %415 = vrot.lane.b32.xlu1 %v369_v16, %s839_s9 }
 0x1bd   : > { %395 = vst.msk [vmem:[%s1038_s8 + $0x20] sm:$0xff] %vm392_vm2, %v364_v18 }
 0x1c0   : > { %413 = vrot.lane.b32.xlu1 %v364_v18, %s839_s9 }
 0x1c1   : > { %v608_v19 = vpop.f32.mrb[0].mxu1 }
 0x1c2   : > { %v379_v20 = vadd.f32 %v608_v19, %v565_v10  ;;  %v373_v21 = vpop.f32.mrb[1].mxu1 }
 0x1c3   : > { %v374_v22 = vadd.f32 %v565_v10, %v373_v21 }
 0x1c4   : > { %398 = vst.msk [vmem:[%s1038_s8 + $0x50] sm:$0xff] %vm392_vm2, %v379_v20  ;;  %419 = vrot.lane.b32.xlu1 %v379_v20, %s839_s9 }
 0x1c5   : > { %397 = vst.msk [vmem:[%s1038_s8 + $0x40] sm:$0xff] %vm392_vm2, %v374_v22 }
 0x1c8   : > { %417 = vrot.lane.b32.xlu1 %v374_v22, %s839_s9 }
 0x1c9   : > { %v611_v23 = vpop.f32.mrb[2].mxu1 }
 0x1ca   : > { %v389_v24 = vadd.f32 %v611_v23, %v565_v10  ;;  %v383_v25 = vpop.f32.mrb[3].mxu1 }
 0x1cb   : > { %v384_v26 = vadd.f32 %v565_v10, %v383_v25 }
 0x1cc   : > { %400 = vst.msk [vmem:[%s1038_s8 + $0x70] sm:$0xff] %vm392_vm2, %v389_v24 }
 0x1cd   : > { %399 = vst.msk [vmem:[%s1038_s8 + $0x60] sm:$0xff] %vm392_vm2, %v384_v26  ;;  %421 = vrot.lane.b32.xlu1 %v384_v26, %s839_s9 }
 0x1d1   : > { %423 = vrot.lane.b32.xlu1 %v389_v24, %s839_s9 }
 0x226   : > { %v412_v27 = vpop.permute.xlu1 %411 }
 0x227   : > { %576 = vst.msk [vmem:[%s1038_s8 + $0x18] sm:$0xff] %vm392_vm2, %v412_v27  ;;  %v410_v28 = vpop.permute.xlu0 %409 }
 0x228   : > { %575 = vst.msk [vmem:[%s1038_s8 + $0x8] sm:$0xff] %vm392_vm2, %v410_v28 }
 0x22e   : > { %v416_v29 = vpop.permute.xlu1 %415 }
 0x22f   : > { %578 = vst.msk [vmem:[%s1038_s8 + $0x38] sm:$0xff] %vm392_vm2, %v416_v29 }
 0x232   : > { %v414_v30 = vpop.permute.xlu1 %413 }
 0x233   : > { %577 = vst.msk [vmem:[%s1038_s8 + $0x28] sm:$0xff] %vm392_vm2, %v414_v30 }
 0x236   : > { %v420_v31 = vpop.permute.xlu1 %419 }
 0x237   : > { %580 = vst.msk [vmem:[%s1038_s8 + $0x58] sm:$0xff] %vm392_vm2, %v420_v31 }
 0x23a   : > { %v418_v32 = vpop.permute.xlu1 %417 }
 0x23b   : > { %579 = vst.msk [vmem:[%s1038_s8 + $0x48] sm:$0xff] %vm392_vm2, %v418_v32 }
 0x23f   : > { %v422_v33 = vpop.permute.xlu1 %421 }
 0x240   : > { %581 = vst.msk [vmem:[%s1038_s8 + $0x68] sm:$0xff] %vm392_vm2, %v422_v33 }
 0x243   : > { %v424_v34 = vpop.permute.xlu1 %423 }
 0x244   : > { %582 = vst.msk [vmem:[%s1038_s8 + $0x78] sm:$0xff] %vm392_vm2, %v424_v34 }
 0x245   : > { %762 = shalt.err (!%p759_p5)
}
 0x246   : > { %s763_s19 = scalar_lea.hbm %s1075_s4, 2048  ;;  %s767_s22 = scalar_lea.hbm %s1131_s3, 4096 }
 0x247   : > { %p764_p10 = scmp.ne.s32.totalorder %s1075_s4, %s763_s19  ;;  %p768_p7 = scmp.lt.u32.totalorder %s1075_s4, %s1131_s3 }
 0x248   : > { %p769_p3 = scmp.lt.u32.totalorder %s767_s22, %s763_s19  ;;  %p771_p11 = scmp.lt.u32.totalorder %s763_s19, %s1075_s4 }
 0x249   : > { %p765_p4 = pnand %p764_p10, %p964_p13 }
 0x24a   : > { %p770_p2 = por %p769_p3, %p768_p7 }
 0x24b   : > { %p766_p1 = pneg %p765_p4 }
 0x24c   : > { %p772_p6 = por %p771_p11, %p770_p2 }
 0x24e   : > { %p773_p8 = pnand %p772_p6, %p766_p1 }
 0x250   : > { %776 = shalt.err (!%p773_p8)
}
 0x251   : > { %s841_s9 = smov 128   ;;  %s842_s10 = smov 8  }
 0x252   : > { %620 = dma.vmem_to_hbm [thread:$0]  (%p964_p13), %s1077_s29, 2048, %s1075_s4, %s443_s6, %s841_s9, %s841_s9, %s842_s10  }
 0x253 PF: > { %s474_s26 = sand.u32 1, %s815_s12   ;;  %p1150_p9 = scmp.ne.s32.totalorder %s1139_s23, 0 }
 0x254   : > { %p1151_p12 = scmp.ge.s32.totalorder %s835_s17, 2  ;;  %s475_s30 = scalar_lea.sflag [#allocation4], %s474_s26 }
 0x256   : > { %p631_p0 = pnand %p1151_p12, %p1150_p9 }
 0x258   : > { %810 = dma.done.wait (!%p631_p0), %s475_s30, 2048  }
 0x259   : > { %812 = vsyncadd (!%p631_p0), %s475_s30, 4294965248  ;;  %s20_s17 = sadd.s32 1, %s835_s17   ;;  %s1152_s12 = smov %s819_s13 }
 0x25a   : > { %p17_p5 = scmp.ge.s32.totalorder %s20_s17, 4   ;;  %s1153_s13 = smov %s823_s14 }
 0x25b   : > { %s1154_s14 = smov %s972_s5  ;;  %s1155_s15 = smov %s831_s16 }
 0x25c   : > { %s1156_s16 = smov %s1158_s28  ;;  %19 = sbr.rel (!%p17_p5) target bundleno = 7 (0x7), region = 82 }
 0x263   :  { %480 = vsyncpa [#allocation3], 1 }
 0x264   :  { %482 = vsyncpa [#allocation3 + $0x1], 1 }
 0x265   :  { %483 = vsyncpa [#allocation6], 1 }
 0x266   :  { %484 = vsyncpa [#allocation4], 1 }
 0x267   :  { %486 = vsyncpa [#allocation4 + $0x1], 1 }

</bundles_post_ra>
